<compile_context>
chip_gen: v5e
topology: v5e:2x2
jax: 0.10.0
libtpu: 0.0.40
codegen_flags: <defaults>
</compile_context>

<pallas_src>
import functools

import jax
import jax.numpy as jnp
from jax.experimental import pallas as pl
from jax.experimental.pallas import tpu as pltpu

_HID_PAD = 128  # pad the hidden dim to one full lane tile


def _round_up(x, m):
    return (x + m - 1) // m * m


def _xavier_uniform(key, fan_out, fan_in, dtype=jnp.float32):
    """PyTorch nn.init.xavier_uniform_ for a Linear weight of shape [out, in]."""
    bound = (6.0 / (fan_in + fan_out)) ** 0.5
    return jax.random.uniform(key, (fan_out, fan_in), dtype=dtype,
                              minval=-bound, maxval=bound)


def vert_valid_kernel(xf_ref, xp_ref, w1f_ref, w1p_ref, b1_ref,
                      w23_ref, b23_ref, out_ref, *, inv_in_dim):
    xf = xf_ref[...].astype(jnp.float32)     # (tm, D)   feature rows
    xp = xp_ref[...].astype(jnp.float32)     # (tm, 3)   position rows

    # LayerNorm(eps=1e-6) statistics over the (virtual) concat of both tiles;
    # the concat itself never materializes in HBM or VMEM.
    s = jnp.sum(xf, axis=-1, keepdims=True) + jnp.sum(xp, axis=-1, keepdims=True)
    mean = s * inv_in_dim
    cf = xf - mean
    cp = xp - mean
    var = (jnp.sum(cf * cf, axis=-1, keepdims=True)
           + jnp.sum(cp * cp, axis=-1, keepdims=True)) * inv_in_dim
    rinv = jax.lax.rsqrt(var + 1e-6)

    # fc1 with the LN affine folded into the (padded, resident) weights,
    # split across the two inputs.  dropout1 is an inference-mode identity.
    pre = (jnp.dot(cf * rinv, w1f_ref[...], preferred_element_type=jnp.float32)
           + jnp.dot(cp * rinv, w1p_ref[...], preferred_element_type=jnp.float32)
           + b1_ref[...])
    h1 = jnp.maximum(pre, 0.0)               # (tm, 128); cols >= hid are exactly 0

    # Fused fc2 @ fc (+ dropout2 identity): logit[r] = sum_k h1[r,k]*w23[k] + b23,
    # computed as a (1, hid_pad) · (tm, hid_pad)^T dot so the result comes out
    # lane-dense as (1, tm).
    logit = jax.lax.dot_general(
        w23_ref[...], h1,
        dimension_numbers=(((1,), (1,)), ((), ())),
        preferred_element_type=jnp.float32)
    out_ref[...] = jax.nn.sigmoid(logit + b23_ref[...])[None]   # (1, 1, tm)


@functools.partial(jax.jit, static_argnames=("tm",))
def vert_valid_forward(verts_f, verts_position, params, tm=2048):
    B, N, D = verts_f.shape
    in_dim = D + 3
    hid = in_dim // 4

    M = B * N
    tm_eff = min(tm, _round_up(M, 8))        # never bigger than the problem
    M_pad = _round_up(M, tm_eff)
    G = M_pad // tm_eff

    xf = verts_f.reshape(M, D)
    xp = verts_position.reshape(M, 3)
    if M_pad != M:                           # zero rows LN to finite values; sliced off below
        xf = jnp.pad(xf, ((0, M_pad - M), (0, 0)))
        xp = jnp.pad(xp, ((0, M_pad - M), (0, 0)))

    f32 = jnp.float32
    ln_w = params["ln_w"].astype(f32)
    ln_b = params["ln_b"].astype(f32)
    w1 = params["w1"].astype(f32)            # [hid, in]
    b1 = params["b1"].astype(f32)            # [hid]
    w2 = params["w2"].astype(f32)            # [hid, hid]
    b2 = params["b2"].astype(f32)            # [hid]
    w3 = params["w3"].astype(f32)            # [1, hid]
    b3 = params["b3"].astype(f32)            # [1]

    # Fold LayerNorm affine into fc1.
    w1t = w1.T                               # [in, hid]
    w1_fold = ln_w[:, None] * w1t
    b1_fold = b1 + ln_b @ w1t                # [hid]

    # Fuse fc2 and the final fc (no nonlinearity between them).
    w23 = (w2.T @ w3.T).reshape(1, hid)      # [1, hid]
    b23 = (b2 @ w3.T + b3).reshape(1, 1)     # [1, 1]

    # Pad hidden dim to a full 128-lane tile (weights are tiny and resident).
    pad_h = _HID_PAD - hid
    w1_fold = jnp.pad(w1_fold, ((0, 0), (0, pad_h)))           # [in, 128]
    b1_fold = jnp.pad(b1_fold, (0, pad_h)).reshape(1, _HID_PAD)
    w23 = jnp.pad(w23, ((0, 0), (0, pad_h)))                   # [1, 128]

    w1f = w1_fold[:D]                        # [D, 128]
    w1p = w1_fold[D:]                        # [3, 128]

    full = lambda i: (0, 0)
    kernel = functools.partial(vert_valid_kernel, inv_in_dim=1.0 / in_dim)

    bytes_accessed = int(M_pad * in_dim * xf.dtype.itemsize    # x read
                         + M_pad * 4                           # output write
                         + (in_dim + 2) * _HID_PAD * 4)        # resident weights
    out = pl.pallas_call(
        kernel,
        out_shape=jax.ShapeDtypeStruct((G, 1, tm_eff), jnp.float32),
        grid_spec=pltpu.PrefetchScalarGridSpec(
            num_scalar_prefetch=0,
            grid=(G,),
            in_specs=[
                pl.BlockSpec((tm_eff, D), lambda i: (i, 0)),   # verts_f rows
                pl.BlockSpec((tm_eff, 3), lambda i: (i, 0)),   # verts_position rows
                pl.BlockSpec((D, _HID_PAD), full),             # fc1 W (feature rows)
                pl.BlockSpec((3, _HID_PAD), full),             # fc1 W (position rows)
                pl.BlockSpec((1, _HID_PAD), full),             # fc1 bias (LN folded)
                pl.BlockSpec((1, _HID_PAD), full),             # fused fc2@fc weight
                pl.BlockSpec((1, 1), full),                    # fused fc2@fc bias
            ],
            out_specs=pl.BlockSpec((1, 1, tm_eff), lambda i: (i, 0, 0)),
        ),
        compiler_params=pltpu.CompilerParams(
            dimension_semantics=("parallel",)),
        cost_estimate=pl.CostEstimate(
            flops=2 * M_pad * _HID_PAD * (in_dim + 1),
            transcendentals=2 * M_pad,
            bytes_accessed=bytes_accessed),
    )(xf, xp, w1f, w1p, b1_fold, w23, b23)

    return out.reshape(M_pad)[:M].reshape(B, N, 1)


def init_vert_valid_params(key, verts_f_dim):
    in_dim = verts_f_dim + 3
    hid_dim = in_dim // 4
    k1, k2, k3 = jax.random.split(key, 3)
    return {
        # LayerNorm: weight=1, bias=0 (PyTorch default)
        "ln_w": jnp.ones((in_dim,), jnp.float32),
        "ln_b": jnp.zeros((in_dim,), jnp.float32),
        # Linear layers: xavier_uniform weight [out, in], zero bias
        "w1": _xavier_uniform(k1, hid_dim, in_dim),
        "b1": jnp.zeros((hid_dim,), jnp.float32),
        "w2": _xavier_uniform(k2, hid_dim, hid_dim),
        "b2": jnp.zeros((hid_dim,), jnp.float32),
        "w3": _xavier_uniform(k3, 1, hid_dim),
        "b3": jnp.zeros((1,), jnp.float32),
    }


def _reference(verts_f, verts_position, params):
    """Pure-JAX reference mirroring the PyTorch forward (eval mode)."""
    x = jnp.concatenate([verts_f, verts_position], axis=-1)
    mean = jnp.mean(x, axis=-1, keepdims=True)
    var = jnp.mean((x - mean) ** 2, axis=-1, keepdims=True)
    xn = (x - mean) / jnp.sqrt(var + 1e-6) * params["ln_w"] + params["ln_b"]
    h1 = jnp.maximum(xn @ params["w1"].T + params["b1"], 0.0)
    h2 = h1 @ params["w2"].T + params["b2"]
    return jax.nn.sigmoid(h2 @ params["w3"].T + params["b3"])


if __name__ == "__main__":
    key = jax.random.PRNGKey(0)
    kf, kp, kw = jax.random.split(key, 3)

    B, N = 2, 8
    verts_f_dim = 29                 # -> in_dim = 32, hid_dim = 8
    verts_f = jax.random.normal(kf, (B, N, verts_f_dim), jnp.float32)
    verts_position = jax.random.normal(kp, (B, N, 3), jnp.float32)

    params = init_vert_valid_params(kw, verts_f_dim)

    valid = vert_valid_forward(verts_f, verts_position, params)
    jax.block_until_ready(valid)

    ref = _reference(verts_f, verts_position, params)
    assert valid.shape == (B, N, 1)
    assert jnp.allclose(valid, ref, atol=1e-5, rtol=1e-5)

    print("KERNEL_OK")
</pallas_src>

<mosaic_0001>
module attributes {stable_mosaic.version = 11 : i64} {
  func.func @vert_valid_kernel(%arg0: i32, %arg1: memref<16x29xf32, #tpu.memory_space<vmem>>, %arg2: memref<16x3xf32, #tpu.memory_space<vmem>>, %arg3: memref<29x128xf32, #tpu.memory_space<vmem>>, %arg4: memref<3x128xf32, #tpu.memory_space<vmem>>, %arg5: memref<1x128xf32, #tpu.memory_space<vmem>>, %arg6: memref<1x128xf32, #tpu.memory_space<vmem>>, %arg7: memref<1x1xf32, #tpu.memory_space<vmem>>, %arg8: memref<1x1x16xf32, #tpu.memory_space<vmem>>) attributes {dimension_semantics = [#tpu.dimension_semantics<parallel>], iteration_bounds = array<i64: 1>, scalar_prefetch = 0 : i64, scratch_operands = 0 : i64, tpu.core_type = #tpu.core_type<tc>, window_params = [{transform_indices = @transform_0, window_bounds = array<i64: 16, 29>}, {transform_indices = @transform_1, window_bounds = array<i64: 16, 3>}, {pipeline_mode = #tpu.pipeline_mode<synchronous>, transform_indices = @transform_2, window_bounds = array<i64: 29, 128>}, {pipeline_mode = #tpu.pipeline_mode<synchronous>, transform_indices = @transform_3, window_bounds = array<i64: 3, 128>}, {pipeline_mode = #tpu.pipeline_mode<synchronous>, transform_indices = @transform_4, window_bounds = array<i64: 1, 128>}, {pipeline_mode = #tpu.pipeline_mode<synchronous>, transform_indices = @transform_5, window_bounds = array<i64: 1, 128>}, {pipeline_mode = #tpu.pipeline_mode<synchronous>, transform_indices = @transform_6, window_bounds = array<i64: 1, 1>}, {transform_indices = @transform_7, window_bounds = array<i64: 1, 1, 16>}]} {
    %c0 = arith.constant 0 : index
    %c0_0 = arith.constant 0 : index
    %0 = vector.load %arg1[%c0, %c0_0] : memref<16x29xf32, #tpu.memory_space<vmem>>, vector<16x29xf32>
    %c0_1 = arith.constant 0 : index
    %c0_2 = arith.constant 0 : index
    %1 = vector.load %arg2[%c0_1, %c0_2] : memref<16x3xf32, #tpu.memory_space<vmem>>, vector<16x3xf32>
    %cst = arith.constant dense<0.000000e+00> : vector<16xf32>
    %2 = vector.multi_reduction <add>, %0, %cst [1] : vector<16x29xf32> to vector<16xf32>
    %3 = vector.shape_cast %2 : vector<16xf32> to vector<16x1xf32>
    %cst_3 = arith.constant dense<0.000000e+00> : vector<16xf32>
    %4 = vector.multi_reduction <add>, %1, %cst_3 [1] : vector<16x3xf32> to vector<16xf32>
    %5 = vector.shape_cast %4 : vector<16xf32> to vector<16x1xf32>
    %6 = arith.addf %3, %5 : vector<16x1xf32>
    %cst_4 = arith.constant 3.125000e-02 : f32
    %7 = vector.broadcast %cst_4 : f32 to vector<16x1xf32>
    %8 = arith.mulf %6, %7 : vector<16x1xf32>
    %9 = vector.broadcast %8 : vector<16x1xf32> to vector<16x29xf32>
    %10 = arith.subf %0, %9 : vector<16x29xf32>
    %11 = vector.broadcast %8 : vector<16x1xf32> to vector<16x3xf32>
    %12 = arith.subf %1, %11 : vector<16x3xf32>
    %13 = arith.mulf %10, %10 : vector<16x29xf32>
    %cst_5 = arith.constant dense<0.000000e+00> : vector<16xf32>
    %14 = vector.multi_reduction <add>, %13, %cst_5 [1] : vector<16x29xf32> to vector<16xf32>
    %15 = vector.shape_cast %14 : vector<16xf32> to vector<16x1xf32>
    %16 = arith.mulf %12, %12 : vector<16x3xf32>
    %cst_6 = arith.constant dense<0.000000e+00> : vector<16xf32>
    %17 = vector.multi_reduction <add>, %16, %cst_6 [1] : vector<16x3xf32> to vector<16xf32>
    %18 = vector.shape_cast %17 : vector<16xf32> to vector<16x1xf32>
    %19 = arith.addf %15, %18 : vector<16x1xf32>
    %cst_7 = arith.constant 3.125000e-02 : f32
    %20 = vector.broadcast %cst_7 : f32 to vector<16x1xf32>
    %21 = arith.mulf %19, %20 : vector<16x1xf32>
    %cst_8 = arith.constant 9.99999997E-7 : f32
    %22 = vector.broadcast %cst_8 : f32 to vector<16x1xf32>
    %23 = arith.addf %21, %22 : vector<16x1xf32>
    %24 = math.rsqrt %23 : vector<16x1xf32>
    %25 = vector.broadcast %24 : vector<16x1xf32> to vector<16x29xf32>
    %26 = arith.mulf %10, %25 : vector<16x29xf32>
    %c0_9 = arith.constant 0 : index
    %c0_10 = arith.constant 0 : index
    %27 = vector.load %arg3[%c0_9, %c0_10] : memref<29x128xf32, #tpu.memory_space<vmem>>, vector<29x128xf32>
    %cst_11 = arith.constant dense<0.000000e+00> : vector<16x128xf32>
    %28 = tpu.matmul %26, %27, %cst_11 {dimension_numbers = #tpu.dot_dimension_numbers<[1], [0], [0], [1], [0, 0, 1, 1], [], []>} : vector<16x29xf32>, vector<29x128xf32>, vector<16x128xf32> -> vector<16x128xf32>
    %29 = vector.broadcast %24 : vector<16x1xf32> to vector<16x3xf32>
    %30 = arith.mulf %12, %29 : vector<16x3xf32>
    %c0_12 = arith.constant 0 : index
    %c0_13 = arith.constant 0 : index
    %31 = vector.load %arg4[%c0_12, %c0_13] : memref<3x128xf32, #tpu.memory_space<vmem>>, vector<3x128xf32>
    %cst_14 = arith.constant dense<0.000000e+00> : vector<16x128xf32>
    %32 = tpu.matmul %30, %31, %cst_14 {dimension_numbers = #tpu.dot_dimension_numbers<[1], [0], [0], [1], [0, 0, 1, 1], [], []>} : vector<16x3xf32>, vector<3x128xf32>, vector<16x128xf32> -> vector<16x128xf32>
    %33 = arith.addf %28, %32 : vector<16x128xf32>
    %c0_15 = arith.constant 0 : index
    %c0_16 = arith.constant 0 : index
    %34 = vector.load %arg5[%c0_15, %c0_16] : memref<1x128xf32, #tpu.memory_space<vmem>>, vector<1x128xf32>
    %35 = vector.broadcast %34 : vector<1x128xf32> to vector<16x128xf32>
    %36 = arith.addf %33, %35 : vector<16x128xf32>
    %cst_17 = arith.constant 0.000000e+00 : f32
    %37 = vector.broadcast %cst_17 : f32 to vector<16x128xf32>
    %38 = arith.maximumf %36, %37 : vector<16x128xf32>
    %c0_18 = arith.constant 0 : index
    %c0_19 = arith.constant 0 : index
    %39 = vector.load %arg6[%c0_18, %c0_19] : memref<1x128xf32, #tpu.memory_space<vmem>>, vector<1x128xf32>
    %cst_20 = arith.constant dense<0.000000e+00> : vector<1x16xf32>
    %40 = tpu.matmul %39, %38, %cst_20 {dimension_numbers = #tpu.dot_dimension_numbers<[1], [1], [0], [0], [0, 0, 1, 0], [], []>} : vector<1x128xf32>, vector<16x128xf32>, vector<1x16xf32> -> vector<1x16xf32>
    %c0_21 = arith.constant 0 : index
    %c0_22 = arith.constant 0 : index
    %41 = vector.load %arg7[%c0_21, %c0_22] : memref<1x1xf32, #tpu.memory_space<vmem>>, vector<1x1xf32>
    %42 = vector.broadcast %41 : vector<1x1xf32> to vector<1x16xf32>
    %43 = arith.addf %40, %42 : vector<1x16xf32>
    %44 = arith.negf %43 : vector<1x16xf32>
    %45 = math.exp %44 : vector<1x16xf32>
    %cst_23 = arith.constant 1.000000e+00 : f32
    %46 = vector.broadcast %cst_23 : f32 to vector<1x16xf32>
    %47 = arith.addf %46, %45 : vector<1x16xf32>
    %48 = arith.divf %46, %47 : vector<1x16xf32>
    %49 = vector.shape_cast %48 : vector<1x16xf32> to vector<1x1x16xf32>
    %c0_24 = arith.constant 0 : index
    %c0_25 = arith.constant 0 : index
    %c0_26 = arith.constant 0 : index
    %50 = vector.load %arg8[%c0_24, %c0_25, %c0_26] : memref<1x1x16xf32, #tpu.memory_space<vmem>>, vector<1x1x16xf32>
    tpu.vector_store %arg8[%c0_24, %c0_25, %c0_26], %49 {strides = array<i32>} : memref<1x1x16xf32, #tpu.memory_space<vmem>>, vector<1x1x16xf32>,
    return
  }
  func.func @transform_0(%arg0: i32) -> (i32, i32) {
    %c0_i32 = arith.constant 0 : i32
    %c0_i32_0 = arith.constant 0 : i32
    return %arg0, %c0_i32 : i32, i32
  }
  func.func @transform_1(%arg0: i32) -> (i32, i32) {
    %c0_i32 = arith.constant 0 : i32
    %c0_i32_0 = arith.constant 0 : i32
    return %arg0, %c0_i32 : i32, i32
  }
  func.func @transform_2(%arg0: i32) -> (i32, i32) {
    %c0_i32 = arith.constant 0 : i32
    %c0_i32_0 = arith.constant 0 : i32
    %c0_i32_1 = arith.constant 0 : i32
    return %c0_i32, %c0_i32_0 : i32, i32
  }
  func.func @transform_3(%arg0: i32) -> (i32, i32) {
    %c0_i32 = arith.constant 0 : i32
    %c0_i32_0 = arith.constant 0 : i32
    %c0_i32_1 = arith.constant 0 : i32
    return %c0_i32, %c0_i32_0 : i32, i32
  }
  func.func @transform_4(%arg0: i32) -> (i32, i32) {
    %c0_i32 = arith.constant 0 : i32
    %c0_i32_0 = arith.constant 0 : i32
    %c0_i32_1 = arith.constant 0 : i32
    return %c0_i32, %c0_i32_0 : i32, i32
  }
  func.func @transform_5(%arg0: i32) -> (i32, i32) {
    %c0_i32 = arith.constant 0 : i32
    %c0_i32_0 = arith.constant 0 : i32
    %c0_i32_1 = arith.constant 0 : i32
    return %c0_i32, %c0_i32_0 : i32, i32
  }
  func.func @transform_6(%arg0: i32) -> (i32, i32) {
    %c0_i32 = arith.constant 0 : i32
    %c0_i32_0 = arith.constant 0 : i32
    %c0_i32_1 = arith.constant 0 : i32
    return %c0_i32, %c0_i32_0 : i32, i32
  }
  func.func @transform_7(%arg0: i32) -> (i32, i32, i32) {
    %c0_i32 = arith.constant 0 : i32
    %c0_i32_0 = arith.constant 0 : i32
    %c0_i32_1 = arith.constant 0 : i32
    return %arg0, %c0_i32, %c0_i32_0 : i32, i32, i32
  }
}

</mosaic_0001>

<bundles_post_ra>
// kernel: vert_valid_forward.1
= control target key start
LH: loop header
LB: loop body
LE: loop exit
PB: predicated region body
PF: predicated region fallthrough
CT: control target
= control target key end

     0   :  { %vm32_vm0 = vcmask 236544   ;;  %vm39_vm1 = vcmask 23552   ;;  %vm144_vm2 = vcmask 1044480   ;;  %vm111_vm3 = vcmask 1042432   ;;  %s357_s0 = inlined_call_operand.vmem [shape: f32[16,29], index: 0, kind: input, shape index: {}]   ;;  %s358_s1 = inlined_call_operand.vmem [shape: f32[16,3], index: 1, kind: input, shape index: {}]   ;;  %s359_s2 = inlined_call_operand.vmem [shape: f32[29,128], index: 2, kind: input, shape index: {}]   ;;  %s360_s3 = inlined_call_operand.vmem [shape: f32[3,128], index: 3, kind: input, shape index: {}]   ;;  %s361_s4 = inlined_call_operand.vmem [shape: f32[1,128], index: 4, kind: input, shape index: {}]   ;;  %s362_s6 = inlined_call_operand.<no memory space> [shape: f32[1,1], index: 6, kind: input, shape index: {}]   ;;  %s363_s5 = inlined_call_operand.vmem [shape: f32[1,128], index: 5, kind: input, shape index: {}]   ;;  %s364_s7 = inlined_call_operand.vmem [shape: f32[1,1,16], index: 7, kind: output, shape index: {}]  }
   0x1   :  { %v29_v0 = vld [vmem:[%s357_s0 + $0x8] sm:$0xff]  ;;  %v28_v1 = vld [vmem:[%s357_s0] sm:$0xff]  ;;  %v101_v28 = vld [vmem:[%s359_s2 + $0x18] sm:$0x1f]  ;;  %v12_v61 = vstv %s362_s6  ;;  %v255_v62 = vmov 0   ;;  %vm226_vm13 = vcmask 122880  }
   0x2   :  { %v36_v2 = vsel %vm32_vm0, %v29_v0, 0.0  ;;  %v33_v3 = vsel %vm32_vm0, %v28_v1, 0.0  ;;  %v31_v4 = vld [vmem:[%s358_s1 + $0x8] sm:$0xff]  ;;  %v30_v5 = vld [vmem:[%s358_s1] sm:$0xff]  ;;  %239 = vmatpush.msk.msra.mxu3 %vm144_vm2, %v101_v28  ;;  %235 = vmatpush.msk.msra.mxu1 %vm144_vm2, %v101_v28  ;;  %v100_v29 = vld [vmem:[%s359_s2 + $0x10] sm:$0xff] }
   0x3   :  { %37 = vadd.xlane.f32.xlu1 %v36_v2  ;;  %34 = vadd.xlane.f32.xlu0 %v33_v3  ;;  %v43_v6 = vsel %vm39_vm1, %v31_v4, 0.0  ;;  %v40_v7 = vsel %vm39_vm1, %v30_v5, 0.0  ;;  %v99_v30 = vld [vmem:[%s359_s2 + $0x8] sm:$0xff]  ;;  %v98_v31 = vld [vmem:[%s359_s2] sm:$0xff]  ;;  %13 = vst [vmem:[#allocation2] sm:$0x1] %v12_v61 }
   0x4   :  { %240 = vmatpush.msra.mxu3 %v100_v29  ;;  %161 = vmatpush.msra.mxu1 %v100_v29  ;;  %v104_v32 = vld [vmem:[%s360_s3] sm:$0x7] }
   0x5   :  { %232 = vmatpush.msk.msra.mxu0 %vm111_vm3, %v104_v32  ;;  %244 = vset.pattern.permute.xlu2 %v255_v62 }
   0x6   :  { %241 = vmatpush.msra.mxu3 %v99_v30  ;;  %162 = vmatpush.msra.mxu1 %v99_v30 }
   0x7   :  { %245 = vset.pattern.permute.xlu0 %v255_v62 }
   0x8   :  { %242 = vmatpush.msra.mxu3 %v98_v31  ;;  %163 = vmatpush.msra.mxu1 %v98_v31 }
   0xa   :  { %v180_v63 = vld [vmem:[#allocation2] sm:$0x1] }
   0xb   :  { %44 = vadd.xlane.f32.xlu1 %v43_v6  ;;  %41 = vadd.xlane.f32.xlu0 %v40_v7  ;;  %v246_v6 = vld [vmem:[%s361_s4] ss:$0 sm:$0xff] }
  0x76   :  { %v38_v8 = vpop.xlane.xlu1 %37  ;;  %v35_v9 = vpop.xlane.xlu0 %34 }
  0x7e   :  { %v45_v10 = vpop.xlane.xlu1 %44  ;;  %v42_v11 = vpop.xlane.xlu0 %41 }
  0x7f   :  { %v47_v12 = vadd.f32 %v45_v10, %v38_v8  ;;  %v46_v13 = vadd.f32 %v42_v11, %v35_v9  ;;  %v179_v11 = vld [vmem:[%s363_s5] sm:$0x1] }
  0x81   :  { %v49_v14 = vmul.f32 0.03125, %v47_v12  ;;  %v48_v15 = vmul.f32 0.03125, %v46_v13 }
  0x83   :  { %v51_v16 = vsub.f32 %v29_v0, %v49_v14  ;;  %v312_v17 = vsub.f32 %v31_v4, %v49_v14  ;;  %v314_v18 = vsub.f32 %v28_v1, %v48_v15  ;;  %v52_v25 = vsub.f32 %v30_v5, %v48_v15 }
  0x85   :  { %v63_v19 = vmul.f32 %v312_v17, %v312_v17  ;;  %v55_v20 = vmul.f32 %v51_v16, %v51_v16  ;;  %v54_v21 = vmul.f32 %v314_v18, %v314_v18  ;;  %v62_v26 = vmul.f32 %v52_v25, %v52_v25 }
  0x87   :  { %v67_v22 = vsel %vm39_vm1, %v63_v19, 0.0  ;;  %v59_v23 = vsel %vm32_vm0, %v55_v20, 0.0  ;;  %v56_v24 = vsel %vm32_vm0, %v54_v21, 0.0  ;;  %v64_v27 = vsel %vm39_vm1, %v62_v26, 0.0 }
  0x88   :  { %68 = vadd.xlane.f32.xlu1 %v67_v22  ;;  %60 = vadd.xlane.f32.xlu0 %v59_v23 }
  0x89   :  { %57 = vadd.xlane.f32.xlu2 %v56_v24 }
  0x91   :  { %65 = vadd.xlane.f32.xlu2 %v64_v27 }
  0xa9   :  { %183 = vperm.xlu2 %244, %v180_v63  }
  0xfb   :  { %v69_v33 = vpop.xlane.xlu1 %68  ;;  %v61_v34 = vpop.xlane.xlu0 %60 }
  0xfc   :  { %v58_v35 = vpop.xlane.xlu2 %57  ;;  %v71_v36 = vadd.f32 %v69_v33, %v61_v34 }
  0xfe   :  { %v73_v37 = vmul.f32 0.03125, %v71_v36 }
 0x100   :  { %v75_v38 = vadd.f32 1e-06, %v73_v37 }
 0x102   :  { %247 = vrsqrt.f32 %v75_v38  ;;  %vm92_vm5 = vweird.f32 %v75_v38 }
 0x104   :  { %v66_v39 = vpop.xlane.xlu2 %65 }
 0x105   :  { %v70_v40 = vadd.f32 %v66_v39, %v58_v35 }
 0x107   :  { %v72_v41 = vmul.f32 0.03125, %v70_v40 }
 0x108   :  { %v248_v42 = vpop.eup %247 }
 0x109   :  { %v87_v43 = vmul.f32 %v248_v42, %v75_v38  ;;  %v74_v44 = vadd.f32 1e-06, %v72_v41  ;;  %vm93_vm4 = vweird.f32 %v248_v42 }
 0x10a   :  { %vm94_vm6 = vmor %vm92_vm5, %vm93_vm4 }
 0x10b   :  { %v88_v45 = vmul.f32 %v248_v42, %v87_v43  ;;  %249 = vrsqrt.f32 %v74_v44  ;;  %vm82_vm8 = vweird.f32 %v74_v44 }
 0x10c   :  { %v184_v12 = vpop.permute.xlu2 %183 }
 0x10d   :  { %v89_v46 = vmul.f32 0.5, %v88_v45  ;;  %v186_v13 = vperm.slane %v184_v12, 0 }
 0x10f   :  { %v90_v47 = vsub.f32 1.5, %v89_v46 }
 0x111   :  { %v250_v48 = vpop.eup %249  ;;  %v91_v49 = vmul.f32 %v248_v42, %v90_v47 }
 0x112   :  { %v77_v50 = vmul.f32 %v250_v48, %v74_v44  ;;  %vm83_vm7 = vweird.f32 %v250_v48 }
 0x113   :  { %v95_v51 = vsel %vm94_vm6, %v248_v42, %v91_v49  ;;  %vm84_vm9 = vmor %vm82_vm8, %vm83_vm7 }
 0x114   :  { %v78_v52 = vmul.f32 %v250_v48, %v77_v50  ;;  %v97_v53 = vmul.f32 %v95_v51, %v51_v16  ;;  %v103_v60 = vmul.f32 %v95_v51, %v312_v17 }
 0x116   :  { %v79_v54 = vmul.f32 0.5, %v78_v52  ;;  %237 = vmatmul.msk.f32.vlgmr.msra.gmra.mxu3 %vm32_vm0, %v97_v53 }
 0x118   :  { %v80_v55 = vsub.f32 1.5, %v79_v54 }
 0x11a   :  { %v81_v56 = vmul.f32 %v250_v48, %v80_v55 }
 0x11c   :  { %v85_v57 = vsel %vm84_vm9, %v250_v48, %v81_v56 }
 0x11d   :  { %v102_v58 = vmul.f32 %v85_v57, %v52_v25  ;;  %v96_v59 = vmul.f32 %v85_v57, %v314_v18 }
 0x11f   :  { %233 = vmatmul.msk.f32.vlgmr.msra.gmra.mxu0 %vm39_vm1, %v102_v58  ;;  %236 = vmatmul.msk.f32.vlgmr.msra.gmra.mxu1 %vm32_vm0, %v96_v59 }
 0x127   :  { %234 = vmatmul.msk.f32.gmra.mxu0 %vm39_vm1, %v103_v60 }
 0x199   :  { %v168_v2 = vpop.f32.mrf.mxu3 }
 0x19c   :  { %v132_v0 = vpop.f32.mrf.mxu0  ;;  %v165_v1 = vpop.f32.mrf.mxu1 }
 0x19d   :  { %v166_v4 = vadd.f32 %v165_v1, %v132_v0 }
 0x19f   :  { %v175_v9 = vadd.f32 %v246_v6, %v166_v4 }
 0x1a1   :  { %v177_v10 = vmax.f32 %v175_v9, 0.0 }
 0x1a4   :  { %v135_v3 = vpop.f32.mrf.mxu0 }
 0x1a5   :  { %v169_v5 = vadd.f32 %v168_v2, %v135_v3 }
 0x1a7   :  { %v176_v7 = vadd.f32 %v246_v6, %v169_v5 }
 0x1a9   :  { %v178_v8 = vmax.f32 %v176_v7, 0.0 }
 0x1ab   :  { %201 = vmatpush.xpose.msra.mxu2 %v178_v8 }
 0x1af   :  { %202 = vmatpush.xpose.msra.mxu2 %v177_v10 }
 0x1b2   :  { %203 = vmatmul.f32.vlgmr.msra.gmra.mxu2 %v179_v11 }
 0x235   :  { %v204_v14 = vpop.f32.mrf.mxu2 }
 0x236   :  { %v205_v15 = vadd.f32 %v204_v14, %v186_v13 }
 0x238   :  { %v238_v16 = vmul.f32 -1.442695, %v205_v15 }
 0x23a   :  { %251 = vpow2.f32 %v238_v16 }
 0x240   :  { %v252_v17 = vpop.eup %251 }
 0x241   :  { %v210_v18 = vadd.f32 1.0, %v252_v17 }
 0x243   :  { %253 = vrcp.f32 %v210_v18  ;;  %v222_v22 = vand.u32 2147483648, %v210_v18  ;;  %v220_v24 = vand.u32 2147483647, %v210_v18  ;;  %vm216_vm11 = vweird.f32 %v210_v18 }
 0x245   :  { %v223_v26 = vor.u32 1.1754944e-38, %v222_v22  ;;  %vm221_vm14 = vcmp.eq.f32.partialorder %v220_v24, 8.507059e+37 }
 0x249   :  { %v254_v19 = vpop.eup %253 }
 0x24a   :  { %v212_v20 = vmul.f32 %v254_v19, %v210_v18  ;;  %vm217_vm10 = vweird.f32 %v254_v19 }
 0x24b   :  { %vm218_vm12 = vmor %vm216_vm11, %vm217_vm10 }
 0x24c   :  { %v213_v21 = vsub.f32 1.0, %v212_v20 }
 0x24e   :  { %v214_v23 = vmul.f32 %v254_v19, %v213_v21 }
 0x250   :  { %v215_v25 = vadd.f32 %v254_v19, %v214_v23 }
 0x252   :  { %v219_v27 = vsel %vm218_vm12, %v254_v19, %v215_v25 }
 0x253   :  { %v224_v28 = vsel %vm221_vm14, %v223_v26, %v219_v27 }
 0x254   :  { %227 = vst.msk [vmem:[%s364_s7] sm:$0x1] %vm226_vm13, %v224_v28 }

</bundles_post_ra>
